<compile_context>
chip_gen: v7x
topology: tpu7x:2x2x1
jax: 0.10.0
libtpu: 0.0.40
codegen_flags: <defaults>
</compile_context>

<pallas_src>
import functools

import jax
import jax.numpy as jnp
from jax.experimental import pallas as pl
from jax.experimental.pallas import tpu as pltpu


def mlp_kernel(x_ref, w1_ref, b1_ref, w2_ref, b2_ref, o_ref):
    # In-kernel bf16 cast of the streamed x tile (single f32 HBM pass outside).
    x = x_ref[...].astype(jnp.bfloat16)
    # Hidden layer: [TB, Din](bf16) @ [Din, Hp](bf16) -> f32 accumulation.
    h = jnp.dot(x, w1_ref[...], preferred_element_type=jnp.float32)
    h = jnp.maximum(h + b1_ref[...], 0.0)  # ReLU, f32 epilogue
    # TODO(synk): Dropout(p=0.5, training) omitted -> identity (eval semantics).
    # Output layer with bf16 operands; padded logit columns carry bias -1e30.
    logits = jnp.dot(h.astype(jnp.bfloat16), w2_ref[...],
                     preferred_element_type=jnp.float32) + b2_ref[...]
    # log_softmax along the class (last) dim; padded columns contribute exp()=0.
    m = jnp.max(logits, axis=1, keepdims=True)
    shifted = logits - m
    lse = jnp.log(jnp.sum(jnp.exp(shifted), axis=1, keepdims=True))
    o_ref[...] = (shifted - lse).astype(o_ref.dtype)


def _round_up(x, m):
    return (x + m - 1) // m * m


def prepare_mlp_params(w1, b1, w2, b2, *, param_dtype=jnp.bfloat16):
    """One-time parameter prep: lane-dense (x128) padding + bf16 cast.

    w1: [dim_in, dim_hidden], b1: [dim_hidden], w2: [dim_hidden, dim_out],
    b2: [dim_out].  Padded w1/w2 entries are zero; padded b2 entries are -1e30
    so padded logit columns vanish from the softmax denominator.
    """
    dim_in, dim_hidden = w1.shape
    dim_out = w2.shape[1]
    hid_p = _round_up(dim_hidden, 128)
    out_p = _round_up(dim_out, 128)

    w1_p = jnp.zeros((dim_in, hid_p), param_dtype).at[:, :dim_hidden].set(
        w1.astype(param_dtype))
    b1_p = jnp.zeros((1, hid_p), jnp.float32).at[:, :dim_hidden].set(
        b1.astype(jnp.float32))
    w2_p = jnp.zeros((hid_p, out_p), param_dtype).at[:dim_hidden, :dim_out].set(
        w2.astype(param_dtype))
    b2_p = jnp.full((1, out_p), -1e30, jnp.float32).at[:, :dim_out].set(
        b2.astype(jnp.float32))
    return w1_p, b1_p, w2_p, b2_p


def _pick_batch_tile(B, tb_max):
    """Batch tile such that the grid has >= 2 (even) steps when B >= 64."""
    if B < 64:
        return B  # single block equal to the full batch dim (layout-legal)
    n_steps = max(2, -(-B // tb_max))
    if n_steps % 2:
        n_steps += 1  # even step count -> balanced split across v7x's 2 TCs
    return min(tb_max, _round_up(-(-B // n_steps), 8))


@functools.partial(jax.jit, static_argnames=("dim_out", "tb_max", "out_dtype"))
def mlp_forward(x_nchw, w1_p, b1_p, w2_p, b2_p, *, dim_out,
                tb_max=2048, out_dtype=jnp.float32):
    """x_nchw: [B, C, H, W]; params from prepare_mlp_params.

    Returns log-probs [B, dim_out] in out_dtype (default float32).
    """
    B = x_nchw.shape[0]
    dim_in = x_nchw.shape[1] * x_nchw.shape[-2] * x_nchw.shape[-1]
    x_flat = x_nchw.reshape(B, dim_in)  # same as torch .view(-1, C*H*W); no cast/pad copies

    hid_p = w1_p.shape[1]
    out_p = w2_p.shape[1]

    TB = _pick_batch_tile(B, tb_max)
    grid = (pl.cdiv(B, TB),)  # ragged last block handled by Pallas, no jnp.pad

    # Honest VMEM budget: double-buffered x/out tiles + resident params +
    # h/logits intermediates, with ~25% margin (clamped to [4, 48] MiB).
    out_bytes = jnp.dtype(out_dtype).itemsize
    vmem_bytes = int(1.25 * (
        2 * TB * dim_in * 4                      # x tiles (f32, double-buffered)
        + 2 * TB * out_p * out_bytes             # out tiles (double-buffered)
        + dim_in * hid_p * 2 + hid_p * out_p * 2 # resident bf16 weights
        + (hid_p + out_p) * 4                    # resident f32 biases
        + 3 * TB * hid_p * 4 + TB * out_p * 4))  # h / logits intermediates
    vmem_bytes = min(max(vmem_bytes, 4 * 1024 * 1024), 48 * 1024 * 1024)

    out = pl.pallas_call(
        mlp_kernel,
        out_shape=jax.ShapeDtypeStruct((B, out_p), out_dtype),
        grid=grid,
        in_specs=[
            pl.BlockSpec((TB, dim_in), lambda i: (i, 0)),     # x: tiled over batch
            pl.BlockSpec((dim_in, hid_p), lambda i: (0, 0)),  # w1: VMEM-resident
            pl.BlockSpec((1, hid_p), lambda i: (0, 0)),       # b1: VMEM-resident
            pl.BlockSpec((hid_p, out_p), lambda i: (0, 0)),   # w2: VMEM-resident
            pl.BlockSpec((1, out_p), lambda i: (0, 0)),       # b2: VMEM-resident
        ],
        out_specs=pl.BlockSpec((TB, out_p), lambda i: (i, 0)),
        compiler_params=pltpu.CompilerParams(
            dimension_semantics=("parallel",),
            vmem_limit_bytes=vmem_bytes,
        ),
    )(x_flat, w1_p, b1_p, w2_p, b2_p)

    return out[:, :dim_out]


if __name__ == "__main__":
    # Small shapes consistent with the module's forward:
    #   x: [B=2, C=4, H=16, W=16]  ->  dim_in = 4*16*16 = 1024
    B, C, H, W = 2, 4, 16, 16
    dim_in = C * H * W
    dim_hidden = 32
    dim_out = 10

    key = jax.random.PRNGKey(0)
    kx, kw1, kb1, kw2, kb2 = jax.random.split(key, 5)

    x = jax.random.normal(kx, (B, C, H, W), dtype=jnp.float32)

    # Deterministic init mimicking nn.Linear (uniform in +/- 1/sqrt(fan_in)).
    bound1 = 1.0 / (dim_in ** 0.5)
    w1 = jax.random.uniform(kw1, (dim_in, dim_hidden), jnp.float32, -bound1, bound1)
    b1 = jax.random.uniform(kb1, (dim_hidden,), jnp.float32, -bound1, bound1)
    bound2 = 1.0 / (dim_hidden ** 0.5)
    w2 = jax.random.uniform(kw2, (dim_hidden, dim_out), jnp.float32, -bound2, bound2)
    b2 = jax.random.uniform(kb2, (dim_out,), jnp.float32, -bound2, bound2)

    # Parameter prep (padding + bf16 cast) happens once, outside the forward path.
    w1_p, b1_p, w2_p, b2_p = prepare_mlp_params(w1, b1, w2, b2)

    out = jax.block_until_ready(
        mlp_forward(x, w1_p, b1_p, w2_p, b2_p, dim_out=dim_out))
    assert out.shape == (B, dim_out), out.shape

    x_flat = x.reshape(B, dim_in)
    # Reference matching the kernel's bf16 matmul operands (f32 accumulation).
    h_ref = jnp.maximum(
        jnp.dot(x_flat.astype(jnp.bfloat16), w1.astype(jnp.bfloat16),
                preferred_element_type=jnp.float32) + b1, 0.0)
    logits_ref = jnp.dot(h_ref.astype(jnp.bfloat16), w2.astype(jnp.bfloat16),
                         preferred_element_type=jnp.float32) + b2
    ref_bf16 = jax.nn.log_softmax(logits_ref, axis=1)
    assert jnp.allclose(out, ref_bf16, atol=2e-3, rtol=2e-3), \
        float(jnp.max(jnp.abs(out - ref_bf16)))

    # Looser check against the pure-f32 torch-equivalent reference.
    ref_f32 = jax.nn.log_softmax(
        jnp.maximum(x_flat @ w1 + b1, 0.0) @ w2 + b2, axis=1)
    assert jnp.allclose(out, ref_f32, atol=5e-2, rtol=5e-2)

    # Extra check: multi-step grid with a ragged last batch block (no jnp.pad path).
    B2 = 200
    x2 = jax.random.normal(jax.random.PRNGKey(1), (B2, C, H, W), dtype=jnp.float32)
    out2 = jax.block_until_ready(
        mlp_forward(x2, w1_p, b1_p, w2_p, b2_p, dim_out=dim_out))
    assert out2.shape == (B2, dim_out)
    assert bool(jnp.all(jnp.isfinite(out2)))
    ref2 = jax.nn.log_softmax(
        jnp.maximum(x2.reshape(B2, dim_in) @ w1 + b1, 0.0) @ w2 + b2, axis=1)
    assert jnp.allclose(out2, ref2, atol=5e-2, rtol=5e-2), \
        float(jnp.max(jnp.abs(out2 - ref2)))

    print("KERNEL_OK")
</pallas_src>

<mosaic_0001>
module attributes {stable_mosaic.version = 11 : i64} {
  func.func @mlp_kernel(%arg0: i32, %arg1: memref<2x1024xf32, #tpu.memory_space<vmem>>, %arg2: memref<1024x128xbf16, #tpu.memory_space<vmem>>, %arg3: memref<1x128xf32, #tpu.memory_space<vmem>>, %arg4: memref<128x128xbf16, #tpu.memory_space<vmem>>, %arg5: memref<1x128xf32, #tpu.memory_space<vmem>>, %arg6: memref<2x128xf32, #tpu.memory_space<vmem>>) attributes {dimension_semantics = [#tpu.dimension_semantics<parallel>], iteration_bounds = array<i64: 1>, scalar_prefetch = 0 : i64, scratch_operands = 0 : i64, tpu.core_type = #tpu.core_type<tc>, window_params = [{transform_indices = @transform_0, window_bounds = array<i64: 2, 1024>}, {pipeline_mode = #tpu.pipeline_mode<synchronous>, transform_indices = @transform_1, window_bounds = array<i64: 1024, 128>}, {pipeline_mode = #tpu.pipeline_mode<synchronous>, transform_indices = @transform_2, window_bounds = array<i64: 1, 128>}, {pipeline_mode = #tpu.pipeline_mode<synchronous>, transform_indices = @transform_3, window_bounds = array<i64: 128, 128>}, {pipeline_mode = #tpu.pipeline_mode<synchronous>, transform_indices = @transform_4, window_bounds = array<i64: 1, 128>}, {transform_indices = @transform_5, window_bounds = array<i64: 2, 128>}]} {
    %c0 = arith.constant 0 : index
    %c0_0 = arith.constant 0 : index
    %0 = vector.load %arg1[%c0, %c0_0] : memref<2x1024xf32, #tpu.memory_space<vmem>>, vector<2x1024xf32>
    %1 = arith.truncf %0 : vector<2x1024xf32> to vector<2x1024xbf16>
    %c0_1 = arith.constant 0 : index
    %c0_2 = arith.constant 0 : index
    %2 = vector.load %arg2[%c0_1, %c0_2] : memref<1024x128xbf16, #tpu.memory_space<vmem>>, vector<1024x128xbf16>
    %cst = arith.constant dense<0.000000e+00> : vector<2x128xf32>
    %3 = tpu.matmul %1, %2, %cst {dimension_numbers = #tpu.dot_dimension_numbers<[1], [0], [0], [1], [0, 0, 1, 1], [], []>} : vector<2x1024xbf16>, vector<1024x128xbf16>, vector<2x128xf32> -> vector<2x128xf32>
    %c0_3 = arith.constant 0 : index
    %c0_4 = arith.constant 0 : index
    %4 = vector.load %arg3[%c0_3, %c0_4] : memref<1x128xf32, #tpu.memory_space<vmem>>, vector<1x128xf32>
    %5 = vector.broadcast %4 : vector<1x128xf32> to vector<2x128xf32>
    %6 = arith.addf %3, %5 : vector<2x128xf32>
    %cst_5 = arith.constant 0.000000e+00 : f32
    %7 = vector.broadcast %cst_5 : f32 to vector<2x128xf32>
    %8 = arith.maximumf %6, %7 : vector<2x128xf32>
    %9 = arith.truncf %8 : vector<2x128xf32> to vector<2x128xbf16>
    %c0_6 = arith.constant 0 : index
    %c0_7 = arith.constant 0 : index
    %10 = vector.load %arg4[%c0_6, %c0_7] : memref<128x128xbf16, #tpu.memory_space<vmem>>, vector<128x128xbf16>
    %cst_8 = arith.constant dense<0.000000e+00> : vector<2x128xf32>
    %11 = tpu.matmul %9, %10, %cst_8 {dimension_numbers = #tpu.dot_dimension_numbers<[1], [0], [0], [1], [0, 0, 1, 1], [], []>} : vector<2x128xbf16>, vector<128x128xbf16>, vector<2x128xf32> -> vector<2x128xf32>
    %c0_9 = arith.constant 0 : index
    %c0_10 = arith.constant 0 : index
    %12 = vector.load %arg5[%c0_9, %c0_10] : memref<1x128xf32, #tpu.memory_space<vmem>>, vector<1x128xf32>
    %13 = vector.broadcast %12 : vector<1x128xf32> to vector<2x128xf32>
    %14 = arith.addf %11, %13 : vector<2x128xf32>
    %cst_11 = arith.constant dense<0xFF800000> : vector<2xf32>
    %15 = vector.multi_reduction <maximumf>, %14, %cst_11 [1] : vector<2x128xf32> to vector<2xf32>
    %16 = vector.shape_cast %15 : vector<2xf32> to vector<2x1xf32>
    %17 = vector.broadcast %16 : vector<2x1xf32> to vector<2x128xf32>
    %18 = arith.subf %14, %17 : vector<2x128xf32>
    %19 = math.exp %18 : vector<2x128xf32>
    %cst_12 = arith.constant dense<0.000000e+00> : vector<2xf32>
    %20 = vector.multi_reduction <add>, %19, %cst_12 [1] : vector<2x128xf32> to vector<2xf32>
    %21 = vector.shape_cast %20 : vector<2xf32> to vector<2x1xf32>
    %22 = math.log %21 : vector<2x1xf32>
    %23 = vector.broadcast %22 : vector<2x1xf32> to vector<2x128xf32>
    %24 = arith.subf %18, %23 : vector<2x128xf32>
    %c0_13 = arith.constant 0 : index
    %c0_14 = arith.constant 0 : index
    %25 = vector.load %arg6[%c0_13, %c0_14] : memref<2x128xf32, #tpu.memory_space<vmem>>, vector<2x128xf32>
    tpu.vector_store %arg6[%c0_13, %c0_14], %24 {strides = array<i32>} : memref<2x128xf32, #tpu.memory_space<vmem>>, vector<2x128xf32>,
    return
  }
  func.func @transform_0(%arg0: i32) -> (i32, i32) {
    %c0_i32 = arith.constant 0 : i32
    %c0_i32_0 = arith.constant 0 : i32
    return %arg0, %c0_i32 : i32, i32
  }
  func.func @transform_1(%arg0: i32) -> (i32, i32) {
    %c0_i32 = arith.constant 0 : i32
    %c0_i32_0 = arith.constant 0 : i32
    %c0_i32_1 = arith.constant 0 : i32
    return %c0_i32, %c0_i32_0 : i32, i32
  }
  func.func @transform_2(%arg0: i32) -> (i32, i32) {
    %c0_i32 = arith.constant 0 : i32
    %c0_i32_0 = arith.constant 0 : i32
    %c0_i32_1 = arith.constant 0 : i32
    return %c0_i32, %c0_i32_0 : i32, i32
  }
  func.func @transform_3(%arg0: i32) -> (i32, i32) {
    %c0_i32 = arith.constant 0 : i32
    %c0_i32_0 = arith.constant 0 : i32
    %c0_i32_1 = arith.constant 0 : i32
    return %c0_i32, %c0_i32_0 : i32, i32
  }
  func.func @transform_4(%arg0: i32) -> (i32, i32) {
    %c0_i32 = arith.constant 0 : i32
    %c0_i32_0 = arith.constant 0 : i32
    %c0_i32_1 = arith.constant 0 : i32
    return %c0_i32, %c0_i32_0 : i32, i32
  }
  func.func @transform_5(%arg0: i32) -> (i32, i32) {
    %c0_i32 = arith.constant 0 : i32
    %c0_i32_0 = arith.constant 0 : i32
    return %arg0, %c0_i32 : i32, i32
  }
}

</mosaic_0001>

<bundles_post_ra>
// kernel: mlp_forward.1
= control target key start
LH: loop header
LB: loop body
LE: loop exit
PB: predicated region body
PF: predicated region fallthrough
CT: control target
= control target key end

     0   :  { %10 = vsyncpa [#allocation3], 0  ;;  %s1338_s0 = inlined_call_operand.vmem [shape: f32[2,1024], index: 0, kind: input, shape index: {}]   ;;  %s1339_s1 = inlined_call_operand.hbm [shape: bf16[1024,128], index: 1, kind: input, shape index: {}]   ;;  %s1340_s2 = inlined_call_operand.vmem [shape: f32[1,128], index: 2, kind: input, shape index: {}]   ;;  %s1341_s3 = inlined_call_operand.vmem [shape: bf16[128,128], index: 3, kind: input, shape index: {}]   ;;  %s1342_s4 = inlined_call_operand.vmem [shape: f32[1,128], index: 4, kind: input, shape index: {}]   ;;  %s1343_s5 = inlined_call_operand.hbm [shape: f32[2,128], index: 5, kind: output, shape index: {}]  }
   0x1   :  { %11 = vsyncpa [#allocation4], 0  ;;  %s1235_s18 = smov [#allocation2]   ;;  %s1187_s22 = scalar_lea.hbm %s1339_s1, 8192 }
   0x2   :  { %s19_s19 = sshll.u32 %s1235_s18, 4  ;;  %p1188_p0 = scmp.ne.s32.totalorder %s1339_s1, %s1187_s22  ;;  %s20_s19 = int_to_ptr.vmem [resolvable:$true] %s19_s19 }
   0x3   :  { %p1191_p1 = scmp.lt.u32.totalorder %s1187_s22, %s1339_s1 }
   0x5   :  { %p1193_p2 = pnand %p1191_p1, %p1188_p0 }
   0x7   :  { %1196 = shalt.err (!%p1193_p2)
}
   0x8   :  { %s1197_s27 = scalar_lea.vmem %s20_s19, 8192  ;;  %p1202_p4 = scmp.lt.s32.totalorder %s20_s19, %s20_s19 }
   0x9   :  { %p1198_p3 = scmp.ne.s32.totalorder %s20_s19, %s1197_s27  ;;  %p1203_p5 = scmp.lt.s32.totalorder %s1197_s27, %s1197_s27 }
   0xb   :  { %p1204_p6 = por %p1203_p5, %p1202_p4 }
   0xd   :  { %p1205_p7 = pnand %p1204_p6, %p1198_p3 }
   0xf   :  { %1208 = shalt.err (!%p1205_p7)
}
  0x10   :  { %s1236_s28 = smov 64   ;;  %s1237_s29 = smov 4  }
  0x11   :  { %25 = dma.hbm_to_vmem [thread:$0]  %s1339_s1, 8192, %s20_s19, [#allocation3], %s1236_s28, %s1236_s28, %s1237_s29  }
  0x12   :  { %1231 = dma.done.wait [#allocation3], 8192  }
  0x13   :  { %1232 = vsyncadd [#allocation3], 4294959104  ;;  %v1109_v0 = vld [vmem:[#allocation2 + $0x40] sm:$0xff]   ;;  %v1113_v4 = vld [vmem:[#allocation2 + $0x48] sm:$0xff]   ;;  %v1238_v22 = vmov 1983009808   ;;  %v44_v24 = vlaneseq }
  0x14   :  { %v1110_v1 = vld [vmem:[#allocation2 + $0xc0] sm:$0xff]   ;;  %985 = vmatprep.subr.bf16.mxu0 %v1109_v0  ;;  %v1114_v5 = vld [vmem:[#allocation2 + $0xc8] sm:$0xff]   ;;  %v1117_v8 = vld [vmem:[#allocation2 + $0x50] sm:$0xff]   ;;  %v42_v23 = vunpack.c.l.s4 %v1238_v22  ;;  %vm1240_vm0 = vmmov 0   ;;  %vm882_vm1 = vcmask 1041408   ;;  %s1241_s27 = smov [#allocation5]  }
  0x15   :  { %v1111_v2 = vld [vmem:[#allocation2] sm:$0xff]   ;;  %1007 = vmatprep.subr.bf16.mxu1 %v1110_v1  ;;  %v1115_v6 = vld [vmem:[#allocation2 + $0x8] sm:$0xff]   ;;  %v1118_v9 = vld [vmem:[#allocation2 + $0xd0] sm:$0xff]   ;;  %v45_v30 = vshrl.u32 %v44_v24, 7 }
  0x16   :  { %v1112_v3 = vld [vmem:[#allocation2 + $0x80] sm:$0xff]   ;;  %986 = vmatpush3.bf16.msra.mxu0 %v1111_v2  ;;  %v1116_v7 = vld [vmem:[#allocation2 + $0x88] sm:$0xff]   ;;  %v1119_v10 = vld [vmem:[#allocation2 + $0x10] sm:$0xff]   ;;  %v43_v29 = vunpack.c.0.s8 %v42_v23 }
  0x17   :  { %1008 = vmatpush3.bf16.msra.mxu1 %v1112_v3  ;;  %987 = vmatprep.subr.bf16.mxu0 %v1113_v4  ;;  %v1120_v11 = vld [vmem:[#allocation2 + $0x90] sm:$0xff]   ;;  %v1121_v12 = vld [vmem:[#allocation2 + $0x58] sm:$0xff]   ;;  %v1125_v16 = vld [vmem:[#allocation2 + $0x60] sm:$0xff]  }
  0x18   :  { %1009 = vmatprep.subr.bf16.mxu1 %v1114_v5  ;;  %v1122_v13 = vld [vmem:[#allocation2 + $0xd8] sm:$0xff]   ;;  %v1126_v17 = vld [vmem:[#allocation2 + $0xe0] sm:$0xff]   ;;  %v1129_v20 = vld [vmem:[#allocation2 + $0x68] sm:$0xff]   ;;  %v1284_v35 = vsub.s32 %v43_v29, %v45_v30 }
  0x19   :  { %v1123_v14 = vld [vmem:[#allocation2 + $0x18] sm:$0xff]   ;;  %v1127_v18 = vld [vmem:[#allocation2 + $0x20] sm:$0xff]   ;;  %v1130_v21 = vld [vmem:[#allocation2 + $0xe8] sm:$0xff]  }
  0x1a   :  { %988 = vmatpush3.bf16.msra.mxu0 %v1115_v6  ;;  %v1124_v15 = vld [vmem:[#allocation2 + $0x98] sm:$0xff]   ;;  %v1128_v19 = vld [vmem:[#allocation2 + $0xa0] sm:$0xff]   ;;  %v1131_v25 = vld [vmem:[#allocation2 + $0x28] sm:$0xff]  }
  0x1b   :  { %1010 = vmatpush3.bf16.msra.mxu1 %v1116_v7  ;;  %989 = vmatprep.subr.bf16.mxu0 %v1117_v8  ;;  %v1132_v26 = vld [vmem:[#allocation2 + $0xa8] sm:$0xff]   ;;  %v1133_v27 = vld [vmem:[#allocation2 + $0x70] sm:$0xff]   ;;  %v1137_v33 = vld [vmem:[#allocation2 + $0x78] sm:$0xff]  }
  0x1c   :  { %1011 = vmatprep.subr.bf16.mxu1 %v1118_v9  ;;  %v1134_v28 = vld [vmem:[#allocation2 + $0xf0] sm:$0xff]   ;;  %v1138_v34 = vld [vmem:[#allocation2 + $0xf8] sm:$0xff]   ;;  %v36_v38 = vld [vmem:[%s1338_s0] sm:$0xff] }
  0x1d   :  { %v1135_v31 = vld [vmem:[#allocation2 + $0x30] sm:$0xff]   ;;  %v1139_v36 = vld [vmem:[#allocation2 + $0x38] sm:$0xff]   ;;  %v47_v39 = vrot.slane %v36_v38, %v1284_v35  ;;  %v40_v40 = vcombine.high %v36_v38, %v36_v38  ;;  %v1142_v41 = vld [vmem:[#allocation2 + $0x140] sm:$0xff]  }
  0x1e   :  { %990 = vmatpush3.bf16.msra.mxu0 %v1119_v10  ;;  %v1136_v32 = vld [vmem:[#allocation2 + $0xb0] sm:$0xff]   ;;  %v1140_v37 = vld [vmem:[#allocation2 + $0xb8] sm:$0xff]   ;;  %v1143_v42 = vld [vmem:[#allocation2 + $0x1c0] sm:$0xff]  }
  0x1f   :  { %1012 = vmatpush3.bf16.msra.mxu1 %v1120_v11  ;;  %991 = vmatprep.subr.bf16.mxu0 %v1121_v12  ;;  %v55_v43 = vcombine.high %v47_v39, %v47_v39  ;;  %v54_v44 = vrot.slane %v40_v40, %v1284_v35  ;;  %v82_v45 = vpack.c.bf16 %v47_v39, %v47_v39  ;;  %v1144_v46 = vld [vmem:[#allocation2 + $0x100] sm:$0xff]   ;;  %v1146_v51 = vld [vmem:[#allocation2 + $0x148] sm:$0xff]   ;;  %v1150_v56 = vld [vmem:[#allocation2 + $0x150] sm:$0xff]  }
  0x20   :  { %1013 = vmatprep.subr.bf16.mxu1 %v1122_v13  ;;  %v1145_v49 = vld [vmem:[#allocation2 + $0x180] sm:$0xff]   ;;  %v1147_v53 = vld [vmem:[#allocation2 + $0x1c8] sm:$0xff]   ;;  %v1151_v57 = vld [vmem:[#allocation2 + $0x1d0] sm:$0xff]  }
  0x21   :  { %v83_v47 = vpack.c.bf16 %v55_v43, %v55_v43  ;;  %v56_v48 = vcombine.high %v54_v44, %v54_v44  ;;  %v84_v50 = vpack.c.bf16 %v54_v44, %v54_v44  ;;  %v1148_v54 = vld [vmem:[#allocation2 + $0x108] sm:$0xff]   ;;  %v1152_v58 = vld [vmem:[#allocation2 + $0x110] sm:$0xff]   ;;  %v1154_v60 = vld [vmem:[#allocation2 + $0x158] sm:$0xff]  }
  0x22   :  { %992 = vmatpush3.bf16.msra.mxu0 %v1123_v14  ;;  %v1149_v55 = vld [vmem:[#allocation2 + $0x188] sm:$0xff]   ;;  %v1153_v59 = vld [vmem:[#allocation2 + $0x190] sm:$0xff]   ;;  %v1155_v61 = vld [vmem:[#allocation2 + $0x1d8] sm:$0xff]  }
  0x23   :  { %1014 = vmatpush3.bf16.msra.mxu1 %v1124_v15  ;;  %993 = vmatprep.subr.bf16.mxu0 %v1125_v16  ;;  %v85_v52 = vpack.c.bf16 %v56_v48, %v56_v48  ;;  %v1156_v62 = vld [vmem:[#allocation2 + $0x118] sm:$0xff]   ;;  %v1158_v0 = vld [vmem:[#allocation2 + $0x160] sm:$0xff]   ;;  %v1162_v4 = vld [vmem:[#allocation2 + $0x168] sm:$0xff]  }
  0x24   :  { %1015 = vmatprep.subr.bf16.mxu1 %v1126_v17  ;;  %641 = vmatprep.mubr.bf16.mxu0 %v83_v47  ;;  %v1157_v63 = vld [vmem:[#allocation2 + $0x198] sm:$0xff]   ;;  %v1159_v1 = vld [vmem:[#allocation2 + $0x1e0] sm:$0xff]   ;;  %v1163_v5 = vld [vmem:[#allocation2 + $0x1e8] sm:$0xff]  }
  0x25   :  { %681 = vmatprep.mubr.bf16.mxu1 %v85_v52  ;;  %v1160_v2 = vld [vmem:[#allocation2 + $0x120] sm:$0xff]   ;;  %v1164_v6 = vld [vmem:[#allocation2 + $0x128] sm:$0xff]   ;;  %v1166_v8 = vld [vmem:[#allocation2 + $0x170] sm:$0xff]  }
  0x26   :  { %994 = vmatpush3.bf16.msra.mxu0 %v1127_v18  ;;  %v1161_v3 = vld [vmem:[#allocation2 + $0x1a0] sm:$0xff]   ;;  %v1165_v7 = vld [vmem:[#allocation2 + $0x1a8] sm:$0xff]   ;;  %v1167_v9 = vld [vmem:[#allocation2 + $0x1f0] sm:$0xff]  }
  0x27   :  { %1016 = vmatpush3.bf16.msra.mxu1 %v1128_v19  ;;  %995 = vmatprep.subr.bf16.mxu0 %v1129_v20  ;;  %v1168_v10 = vld [vmem:[#allocation2 + $0x130] sm:$0xff]   ;;  %v1170_v12 = vld [vmem:[#allocation2 + $0x178] sm:$0xff]   ;;  %v37_v15 = vld [vmem:[%s1338_s0 + $0x8] sm:$0xff] }
  0x28   :  { %1017 = vmatprep.subr.bf16.mxu1 %v1130_v21  ;;  %v1169_v11 = vld [vmem:[#allocation2 + $0x1b0] sm:$0xff]   ;;  %v1171_v13 = vld [vmem:[#allocation2 + $0x1f8] sm:$0xff]   ;;  %v64_v17 = vrot.slane %v37_v15, %v1284_v35  ;;  %v57_v18 = vcombine.high %v37_v15, %v37_v15 }
  0x29   :  { %v1172_v14 = vld [vmem:[#allocation2 + $0x138] sm:$0xff]   ;;  %v1177_v29 = vld [vmem:[%s1341_s3 + $0x10] sm:$0xff]  }
  0x2a   :  { %996 = vmatpush3.bf16.msra.mxu0 %v1131_v25  ;;  %v1173_v16 = vld [vmem:[#allocation2 + $0x1b8] sm:$0xff]   ;;  %v72_v19 = vcombine.high %v64_v17, %v64_v17  ;;  %v71_v20 = vrot.slane %v57_v18, %v1284_v35  ;;  %v86_v21 = vpack.c.bf16 %v64_v17, %v64_v17 }
  0x2b   :  { %1018 = vmatpush3.bf16.msra.mxu1 %v1132_v26  ;;  %997 = vmatprep.subr.bf16.mxu0 %v1133_v27  ;;  %v1175_v26 = vld [vmem:[%s1341_s3] sm:$0xff]   ;;  %v1239_v27 = vmov 0.0   ;;  %v1178_v30 = vld [vmem:[%s1341_s3 + $0x18] sm:$0xff]  }
  0x2c   :  { %1019 = vmatprep.subr.bf16.mxu1 %v1134_v28  ;;  %v87_v22 = vpack.c.bf16 %v72_v19, %v72_v19  ;;  %v73_v23 = vcombine.high %v71_v20, %v71_v20  ;;  %v88_v24 = vpack.c.bf16 %v71_v20, %v71_v20  ;;  %v1176_v28 = vld [vmem:[%s1341_s3 + $0x8] sm:$0xff]  }
  0x2e   :  { %998 = vmatpush3.bf16.msra.mxu0 %v1135_v31  ;;  %v89_v25 = vpack.c.bf16 %v73_v23, %v73_v23  ;;  %v1179_v31 = vld [vmem:[%s1341_s3 + $0x20] sm:$0xff]  }
  0x2f   :  { %1020 = vmatpush3.bf16.msra.mxu1 %v1136_v32  ;;  %999 = vmatprep.subr.bf16.mxu0 %v1137_v33  ;;  %v1180_v32 = vld [vmem:[%s1341_s3 + $0x28] sm:$0xff]   ;;  %v1181_v33 = vld [vmem:[%s1341_s3 + $0x30] sm:$0xff]  }
  0x30   :  { %1021 = vmatprep.subr.bf16.mxu1 %v1138_v34  ;;  %v1182_v34 = vld [vmem:[%s1341_s3 + $0x38] sm:$0xff]  }
  0x32   :  { %1000 = vmatpush3.bf16.msra.mxu0 %v1139_v36  ;;  %v911_v36 = vld [vmem:[%s1340_s2] ss:$0 sm:$0xff] }
  0x33   :  { %1022 = vmatpush3.bf16.msra.mxu1 %v1140_v37  ;;  %1029 = vmatprep.subr.bf16.mxu0 %v1142_v41 }
  0x34   :  { %1051 = vmatprep.subr.bf16.mxu1 %v1143_v42 }
  0x35   :  { %642 = vmatmul.mubr.bf16.vlgmr.msra.gmra.mrb[0].mxu0 %v82_v45 }
  0x36   :  { %1030 = vmatpush3.bf16.msra.mxu0 %v1144_v46  ;;  %682 = vmatmul.mubr.bf16.vlgmr.msra.gmra.mrb[0].mxu1 %v84_v50 }
  0x37   :  { %1031 = vmatprep.subr.bf16.mxu0 %v1146_v51  ;;  %1052 = vmatpush3.bf16.msra.mxu1 %v1145_v49 }
  0x38   :  { %1053 = vmatprep.subr.bf16.mxu1 %v1147_v53  ;;  %721 = vmatprep.mubr.bf16.mxu0 %v87_v22 }
  0x39   :  { %761 = vmatprep.mubr.bf16.mxu1 %v89_v25 }
  0x3a   :  { %1032 = vmatpush3.bf16.msra.mxu0 %v1148_v54 }
  0x3b   :  { %1033 = vmatprep.subr.bf16.mxu0 %v1150_v56  ;;  %1054 = vmatpush3.bf16.msra.mxu1 %v1149_v55 }
  0x3c   :  { %1055 = vmatprep.subr.bf16.mxu1 %v1151_v57 }
  0x3e   :  { %1034 = vmatpush3.bf16.msra.mxu0 %v1152_v58 }
  0x3f   :  { %1035 = vmatprep.subr.bf16.mxu0 %v1154_v60  ;;  %1056 = vmatpush3.bf16.msra.mxu1 %v1153_v59 }
  0x40   :  { %1057 = vmatprep.subr.bf16.mxu1 %v1155_v61 }
  0x42   :  { %1036 = vmatpush3.bf16.msra.mxu0 %v1156_v62  ;;  %v976_v62 = vld [vmem:[%s1342_s4] ss:$0 sm:$0xff]  ;;  %s902_s4 = sshll.u32 %s1241_s27, 4  ;;  %s903_s4 = int_to_ptr.vmem [resolvable:$true] %s902_s4 }
  0x43   :  { %1037 = vmatprep.subr.bf16.mxu0 %v1158_v0  ;;  %1058 = vmatpush3.bf16.msra.mxu1 %v1157_v63  ;;  %s1209_s28 = scalar_lea.vmem %s903_s4, 32  ;;  %p1214_p9 = scmp.lt.s32.totalorder %s903_s4, %s903_s4 }
  0x44   :  { %1059 = vmatprep.subr.bf16.mxu1 %v1159_v1  ;;  %p1210_p8 = scmp.ne.s32.totalorder %s903_s4, %s1209_s28  ;;  %p1215_p10 = scmp.lt.s32.totalorder %s1209_s28, %s1209_s28 }
  0x46   :  { %1038 = vmatpush3.bf16.msra.mxu0 %v1160_v2  ;;  %p1216_p11 = por %p1215_p10, %p1214_p9 }
  0x47   :  { %1039 = vmatprep.subr.bf16.mxu0 %v1162_v4  ;;  %1060 = vmatpush3.bf16.msra.mxu1 %v1161_v3 }
  0x48   :  { %1061 = vmatprep.subr.bf16.mxu1 %v1163_v5  ;;  %p1217_p12 = pnand %p1216_p11, %p1210_p8 }
  0x4a   :  { %1040 = vmatpush3.bf16.msra.mxu0 %v1164_v6 }
  0x4b   :  { %1041 = vmatprep.subr.bf16.mxu0 %v1166_v8  ;;  %1062 = vmatpush3.bf16.msra.mxu1 %v1165_v7 }
  0x4c   :  { %1063 = vmatprep.subr.bf16.mxu1 %v1167_v9 }
  0x4e   :  { %1042 = vmatpush3.bf16.msra.mxu0 %v1168_v10 }
  0x4f   :  { %1043 = vmatprep.subr.bf16.mxu0 %v1170_v12  ;;  %1064 = vmatpush3.bf16.msra.mxu1 %v1169_v11 }
  0x50   :  { %1065 = vmatprep.subr.bf16.mxu1 %v1171_v13 }
  0x52   :  { %1044 = vmatpush3.bf16.msra.mxu0 %v1172_v14 }
  0x53   :  { %1066 = vmatpush3.bf16.msra.mxu1 %v1173_v16  ;;  %1082 = vmatprep.subr.bf16.mxu0 %v1239_v27 }
  0x55   :  { %722 = vmatmul.mubr.bf16.vlgmr.msra.gmra.mrb[4].mxu0 %v86_v21 }
  0x56   :  { %762 = vmatmul.mubr.bf16.vlgmr.msra.gmra.mrb[4].mxu1 %v88_v24  ;;  %1083 = vmatpush3.bf16.msra.mxu0 %v1175_v26 }
  0x57   :  { %1084 = vmatprep.subr.bf16.mxu0 %v1239_v27  ;;  %1098 = vmatprep.mubr.msk.bf16.mxu0 %vm1240_vm0, %v1239_v27 }
  0x5a   :  { %1085 = vmatpush3.bf16.msra.mxu0 %v1176_v28 }
  0x5b   :  { %1086 = vmatprep.subr.bf16.mxu0 %v1239_v27 }
  0x5e   :  { %1087 = vmatpush3.bf16.msra.mxu0 %v1177_v29 }
  0x5f   :  { %1088 = vmatprep.subr.bf16.mxu0 %v1239_v27 }
  0x62   :  { %1089 = vmatpush3.bf16.msra.mxu0 %v1178_v30 }
  0x63   :  { %1090 = vmatprep.subr.bf16.mxu0 %v1239_v27 }
  0x66   :  { %1091 = vmatpush3.bf16.msra.mxu0 %v1179_v31 }
  0x67   :  { %1092 = vmatprep.subr.bf16.mxu0 %v1239_v27 }
  0x6a   :  { %1093 = vmatpush3.bf16.msra.mxu0 %v1180_v32 }
  0x6b   :  { %1094 = vmatprep.subr.bf16.mxu0 %v1239_v27 }
  0x6e   :  { %1095 = vmatpush3.bf16.msra.mxu0 %v1181_v33 }
  0x6f   :  { %1096 = vmatprep.subr.bf16.mxu0 %v1239_v27 }
  0x72   :  { %1097 = vmatpush3.bf16.msra.mxu0 %v1182_v34 }
 0x108   :  { %v1001_v35 = vpop.f32.mrb[0].mxu0 }
 0x109   :  { %v1002_v37 = vpop.f32.mrb[1].mxu0  ;;  %v1023_v38 = vpop.f32.mrb[0].mxu1 }
 0x10a   :  { %v1003_v39 = vadd.f32 %v1002_v37, %v1001_v35  ;;  %v1004_v40 = vpop.f32.mrb[2].mxu0  ;;  %v1024_v41 = vpop.f32.mrb[1].mxu1 }
 0x10b   :  { %v1005_v42 = vpop.f32.mrb[3].mxu0  ;;  %v1025_v44 = vadd.f32 %v1024_v41, %v1023_v38  ;;  %v1026_v45 = vpop.f32.mrb[2].mxu1 }
 0x10c   :  { %v644_v43 = vadd.f32 %v1003_v39, %v911_v36  ;;  %v1027_v46 = vpop.f32.mrb[3].mxu1 }
 0x10e   :  { %v684_v47 = vadd.f32 %v1025_v44, %v644_v43 }
 0x128   :  { %v1045_v48 = vpop.f32.mrb[4].mxu0 }
 0x129   :  { %v1046_v49 = vpop.f32.mrb[5].mxu0  ;;  %v1067_v50 = vpop.f32.mrb[4].mxu1 }
 0x12a   :  { %v1047_v51 = vadd.f32 %v1046_v49, %v1045_v48  ;;  %v1048_v52 = vpop.f32.mrb[6].mxu0  ;;  %v1068_v53 = vpop.f32.mrb[5].mxu1 }
 0x12b   :  { %v1049_v54 = vpop.f32.mrb[7].mxu0  ;;  %v1069_v56 = vadd.f32 %v1068_v53, %v1067_v50  ;;  %v1070_v57 = vpop.f32.mrb[6].mxu1 }
 0x12c   :  { %v724_v55 = vadd.f32 %v1047_v51, %v684_v47  ;;  %v1071_v58 = vpop.f32.mrb[7].mxu1 }
 0x12e   :  { %v764_v59 = vadd.f32 %v1069_v56, %v724_v55 }
 0x130   :  { %v769_v60 = vmax.f32 %v764_v59, 0.0 }
 0x132   :  { %v770_v61 = vpack.c.bf16 %v769_v60, %v769_v60 }
 0x134   :  { %1099 = vmatmul.mubr.bf16.vlgmr.msra.gmra.mrb[8].mxu0 %v770_v61 }
 0x207   :  { %v876_v63 = vpop.f32.mrb[8].mxu0 }
 0x208   :  { %v877_v0 = vadd.f32 %v976_v62, %v876_v63  ;;  %v1100_v1 = vpop.f32.mrb[9].mxu0 }
 0x209   :  { %v879_v2 = vpop.f32.mrb[10].mxu0 }
 0x20a   :  { %v1101_v3 = vpop.f32.mrb[11].mxu0  ;;  %v883_v4 = vsel %vm882_vm1, %v877_v0, -inf }
 0x20b   :  { %884 = vmax.xlane.f32.xlu0 %v883_v4 }
 0x298   :  { %v885_v5 = vpop.xlane.xlu0 %884 }
 0x299   :  { %v886_v6 = vsub.f32 %v877_v0, %v885_v5 }
 0x29b   :  { %v887_v7 = vmul.f32 1.442695, %v886_v6 }
 0x29d   :  { %1183 = vpow2.f32 %v887_v7 }
 0x2a7   :  { %v1184_v8 = vpop.eup %1183 }
 0x2a8   :  { %v889_v9 = vsel %vm882_vm1, %v1184_v8, 0.0 }
 0x2a9   :  { %890 = vadd.xlane.f32.xlu0 %v889_v9 }
 0x336   :  { %v891_v10 = vpop.xlane.xlu0 %890 }
 0x337   :  { %1185 = vlog2.f32 %v891_v10 }
 0x341   :  { %v1186_v11 = vpop.eup %1185 }
 0x342   :  { %v893_v12 = vmul.f32 0.6931472, %v1186_v11 }
 0x344   :  { %v894_v13 = vsub.f32 %v886_v6, %v893_v12 }
 0x346   :  { %895 = vst [vmem:[#allocation5] sm:$0x3] %v894_v13 }
 0x347   :  { %1220 = shalt.err (!%p1217_p12)
}
 0x348   :  { %s1221_s6 = scalar_lea.hbm %s1343_s5, 32 }
 0x349   :  { %p1222_p13 = scmp.ne.s32.totalorder %s1343_s5, %s1221_s6  ;;  %p1225_p0 = scmp.lt.u32.totalorder %s1221_s6, %s1343_s5 }
 0x34b   :  { %p1227_p1 = pnand %p1225_p0, %p1222_p13 }
 0x34d   :  { %1230 = shalt.err (!%p1227_p1)
}
 0x34e   :  { %905 = dma.vmem_to_hbm [thread:$0]  %s903_s4, 32, %s1343_s5, [#allocation4]  }
 0x34f   :  { %1233 = dma.done.wait [#allocation4], 32  }
 0x350   :  { %1234 = vsyncadd [#allocation4], 4294967264 }
 0x351   :  { %909 = vsyncpa [#allocation3], 1 }
 0x352   :  { %910 = vsyncpa [#allocation4], 1 }

</bundles_post_ra>
